<compile_context>
chip_gen: v7x
topology: tpu7x:2x2x1
jax: 0.10.0
libtpu: 0.0.40
codegen_flags: <defaults>
</compile_context>

<pallas_src>
import functools

import jax
import jax.numpy as jnp
from jax.experimental import pallas as pl
from jax.experimental.pallas import tpu as pltpu


# ---------------------------------------------------------------------------
# Fused kernel: per-sample stats (own + swap partner), dsh alpha (softmax over C),
# statistic mixing and the per-channel affine renormalization, all in one pass.
# Grid iterates over N; each step sees x[n] and x[idx_swap[n]] as (1, C, HWp) tiles
# (partner tile fetched via a data-dependent index_map on the prefetched idx_swap).
# ---------------------------------------------------------------------------
def _style_rand_kernel(idx_ref, x_ref, xs_ref, o_ref, *, eps, hw_real, needs_mask):
    del idx_ref  # consumed only by the index_maps (scalar prefetch)

    x = x_ref[...].astype(jnp.float32)                     # (1, C, HWp) own sample
    xs = xs_ref[...].astype(jnp.float32)                   # (1, C, HWp) swap partner

    inv_n = 1.0 / hw_real
    # torch unbiased var divides by (HW-1); guard the degenerate HW==1 case.
    inv_nm1 = 1.0 / max(hw_real - 1, 1)

    if needs_mask:
        lane = jax.lax.broadcasted_iota(jnp.int32, x.shape, dimension=2)
        mask = lane < hw_real
    else:
        mask = None

    def _stats(t):
        # Padded lanes (if any) are zero, so a plain lane-sum is already the masked
        # sum for the mean; only the squared-deviation sum needs the lane mask.
        m = jnp.sum(t, axis=-1, keepdims=True) * inv_n      # (1, C, 1)
        d = t - m
        dm = jnp.where(mask, d, 0.0) if mask is not None else d
        v = jnp.sum(dm * dm, axis=-1, keepdims=True) * inv_nm1
        return m, v, d

    mean, var, d = _stats(x)            # d = x - mean, reused for the output affine
    mean_s, var_s, _ = _stats(xs)

    std = jnp.sqrt(var + eps)                               # (1, C, 1)
    std_s = jnp.sqrt(var_s + eps)

    # 'dsh': alpha = softmax over the channel axis (axis=1) of 1/(1+distance)
    distance = (mean - mean_s) ** 2 + std * std + std_s * std_s - 2.0 * std * std_s
    a = 1.0 / (1.0 + distance)                              # (1, C, 1)
    a_max = jnp.max(a, axis=1, keepdims=True)
    e = jnp.exp(a - a_max)
    alpha = e / jnp.sum(e, axis=1, keepdims=True)

    mean_mix = alpha * mean + (1.0 - alpha) * mean_s
    var_mix = alpha * var + (1.0 - alpha) * var_s

    # (x - mean)/std * sqrt(var_mix+eps) + mean_mix collapsed into one per-channel
    # affine on d; the divide touches only C elements.
    scale = jnp.sqrt(var_mix + eps) / std                   # (1, C, 1)
    o_ref[...] = (d * scale + mean_mix).astype(o_ref.dtype)


def style_randomization(x, idx_swap, *, eps=1e-6, core_parallel=False):
    """x: (N, C, H, W) float32/bfloat16, idx_swap: (N,) int32 permutation of range(N).

    Set core_parallel=True on v7x to shard the N grid axis across both TensorCores.
    """
    N, C, H, W = x.shape
    HW = H * W
    HWp = ((HW + 127) // 128) * 128          # lane-dense output: pad HW to 128 lanes
    needs_mask = HWp != HW

    xr = x.reshape(N, C, HW)
    if needs_mask:
        xr = jnp.pad(xr, ((0, 0), (0, 0), (0, HWp - HW)))

    # index_maps get (grid idx, *prefetch refs); idx_swap lives in SMEM.
    tile_own = pl.BlockSpec((1, C, HWp), lambda n, idx: (n, 0, 0))
    tile_partner = pl.BlockSpec((1, C, HWp), lambda n, idx: (idx[n], 0, 0))

    # VMEM budget: own + partner + output tiles, each double-buffered (6 tiles in
    # x.dtype), plus ~4 full-tile f32 temporaries inside the kernel body.
    itemsize = jnp.dtype(x.dtype).itemsize
    tile_io_bytes = C * HWp * itemsize
    tile_f32_bytes = C * HWp * 4
    needed = 6 * tile_io_bytes + 4 * tile_f32_bytes
    vmem_limit = int(min(max(needed * 1.25, 32 * 1024 * 1024), 100 * 1024 * 1024))

    dim_sem = (pltpu.CORE_PARALLEL if core_parallel else "parallel",)

    # TODO(synk): if the partner DMA shows up as exposed time in a trace, sweep
    # pipeline_mode=pl.Buffered(3) on tile_partner (costs one extra tile of VMEM).
    out = pl.pallas_call(
        functools.partial(
            _style_rand_kernel, eps=eps, hw_real=HW, needs_mask=needs_mask
        ),
        out_shape=jax.ShapeDtypeStruct((N, C, HWp), x.dtype),
        grid_spec=pltpu.PrefetchScalarGridSpec(
            num_scalar_prefetch=1,
            grid=(N,),
            in_specs=[tile_own, tile_partner],
            out_specs=tile_own,
        ),
        compiler_params=pltpu.CompilerParams(
            dimension_semantics=dim_sem,
            vmem_limit_bytes=vmem_limit,
        ),
    )(idx_swap, xr, xr)

    if needs_mask:
        out = out[:, :, :HW]
    return out.reshape(N, C, H, W)


# ---------------------------------------------------------------------------
# Pure-JAX reference (mirrors the PyTorch forward) for a silent sanity check.
# ---------------------------------------------------------------------------
def _reference(x, idx_swap, eps=1e-6):
    N, C, H, W = x.shape
    xr = x.reshape(N, C, -1)
    mean = xr.mean(-1, keepdims=True)
    var = xr.var(-1, ddof=1, keepdims=True)
    std = jnp.sqrt(var + eps)
    xn = (xr - mean) / std
    mean_s, var_s, std_s = mean[idx_swap], var[idx_swap], std[idx_swap]
    distance = (mean - mean_s) ** 2 + std**2 + std_s**2 - 2 * std * std_s
    alpha = jax.nn.softmax(1.0 / (1.0 + distance), axis=1)
    mean_m = alpha * mean + (1 - alpha) * mean_s
    var_m = alpha * var + (1 - alpha) * var_s
    return (xn * jnp.sqrt(var_m + eps) + mean_m).reshape(N, C, H, W)


if __name__ == "__main__":
    key = jax.random.PRNGKey(0)
    kx, kx2, kperm = jax.random.split(key, 3)

    # --- 1) f32, 128-lane-aligned HW (fast path, no masking) -------------------
    N, C, H, W = 2, 4, 16, 16
    x = jax.random.normal(kx, (N, C, H, W), dtype=jnp.float32) * 2.0 + 0.5
    # mix='random': permutation generated host-side (JAX PRNG) and passed in.
    idx_swap = jax.random.permutation(kperm, N).astype(jnp.int32)

    out = jax.block_until_ready(style_randomization(x, idx_swap, eps=1e-6))
    ref = _reference(x, idx_swap, eps=1e-6)
    assert out.shape == x.shape and out.dtype == x.dtype
    assert jnp.allclose(out, ref, atol=1e-4, rtol=1e-4), "f32 aligned mismatch"

    # --- 2) f32, odd HW (exercises the padded / lane-masked reduction path) ----
    H2, W2 = 5, 7
    x2 = jax.random.normal(kx2, (N, C, H2, W2), dtype=jnp.float32) * 1.5 - 0.3
    out2 = jax.block_until_ready(style_randomization(x2, idx_swap, eps=1e-6))
    ref2 = _reference(x2, idx_swap, eps=1e-6)
    assert out2.shape == x2.shape and out2.dtype == x2.dtype
    assert jnp.allclose(out2, ref2, atol=1e-4, rtol=1e-4), "f32 padded mismatch"

    # --- 3) bf16 I/O (f32 math inside the kernel, cast at the store) -----------
    xb = x.astype(jnp.bfloat16)
    outb = jax.block_until_ready(style_randomization(xb, idx_swap, eps=1e-6))
    refb = _reference(xb.astype(jnp.float32), idx_swap, eps=1e-6)
    assert outb.shape == xb.shape and outb.dtype == jnp.bfloat16
    assert jnp.allclose(outb.astype(jnp.float32), refb, atol=1e-1, rtol=1e-1), (
        "bf16 mismatch"
    )

    print("KERNEL_OK")
</pallas_src>

<mosaic_0001>
module attributes {stable_mosaic.version = 11 : i64} {
  func.func @_style_rand_kernel(%arg0: i32, %arg1: memref<2xi32, #tpu.memory_space<smem>>, %arg2: memref<1x4x256xf32, #tpu.memory_space<vmem>>, %arg3: memref<1x4x256xf32, #tpu.memory_space<vmem>>, %arg4: memref<1x4x256xf32, #tpu.memory_space<vmem>>) attributes {dimension_semantics = [#tpu.dimension_semantics<parallel>], iteration_bounds = array<i64: 2>, scalar_prefetch = 1 : i64, scratch_operands = 0 : i64, tpu.core_type = #tpu.core_type<tc>, window_params = [{transform_indices = @transform_0, window_bounds = array<i64: 1, 4, 256>}, {transform_indices = @transform_1, window_bounds = array<i64: 1, 4, 256>}, {transform_indices = @transform_2, window_bounds = array<i64: 1, 4, 256>}]} {
    %c0 = arith.constant 0 : index
    %c0_0 = arith.constant 0 : index
    %c0_1 = arith.constant 0 : index
    %0 = vector.load %arg2[%c0, %c0_0, %c0_1] : memref<1x4x256xf32, #tpu.memory_space<vmem>>, vector<1x4x256xf32>
    %c0_2 = arith.constant 0 : index
    %c0_3 = arith.constant 0 : index
    %c0_4 = arith.constant 0 : index
    %1 = vector.load %arg3[%c0_2, %c0_3, %c0_4] : memref<1x4x256xf32, #tpu.memory_space<vmem>>, vector<1x4x256xf32>
    %cst = arith.constant dense<0.000000e+00> : vector<1x4xf32>
    %2 = vector.multi_reduction <add>, %0, %cst [2] : vector<1x4x256xf32> to vector<1x4xf32>
    %3 = vector.shape_cast %2 : vector<1x4xf32> to vector<1x4x1xf32>
    %cst_5 = arith.constant 3.906250e-03 : f32
    %4 = vector.broadcast %cst_5 : f32 to vector<1x4x1xf32>
    %5 = arith.mulf %3, %4 : vector<1x4x1xf32>
    %6 = vector.broadcast %5 : vector<1x4x1xf32> to vector<1x4x256xf32>
    %7 = arith.subf %0, %6 : vector<1x4x256xf32>
    %8 = arith.mulf %7, %7 : vector<1x4x256xf32>
    %cst_6 = arith.constant dense<0.000000e+00> : vector<1x4xf32>
    %9 = vector.multi_reduction <add>, %8, %cst_6 [2] : vector<1x4x256xf32> to vector<1x4xf32>
    %10 = vector.shape_cast %9 : vector<1x4xf32> to vector<1x4x1xf32>
    %cst_7 = arith.constant 0.00392156886 : f32
    %11 = vector.broadcast %cst_7 : f32 to vector<1x4x1xf32>
    %12 = arith.mulf %10, %11 : vector<1x4x1xf32>
    %cst_8 = arith.constant dense<0.000000e+00> : vector<1x4xf32>
    %13 = vector.multi_reduction <add>, %1, %cst_8 [2] : vector<1x4x256xf32> to vector<1x4xf32>
    %14 = vector.shape_cast %13 : vector<1x4xf32> to vector<1x4x1xf32>
    %cst_9 = arith.constant 3.906250e-03 : f32
    %15 = vector.broadcast %cst_9 : f32 to vector<1x4x1xf32>
    %16 = arith.mulf %14, %15 : vector<1x4x1xf32>
    %17 = vector.broadcast %16 : vector<1x4x1xf32> to vector<1x4x256xf32>
    %18 = arith.subf %1, %17 : vector<1x4x256xf32>
    %19 = arith.mulf %18, %18 : vector<1x4x256xf32>
    %cst_10 = arith.constant dense<0.000000e+00> : vector<1x4xf32>
    %20 = vector.multi_reduction <add>, %19, %cst_10 [2] : vector<1x4x256xf32> to vector<1x4xf32>
    %21 = vector.shape_cast %20 : vector<1x4xf32> to vector<1x4x1xf32>
    %cst_11 = arith.constant 0.00392156886 : f32
    %22 = vector.broadcast %cst_11 : f32 to vector<1x4x1xf32>
    %23 = arith.mulf %21, %22 : vector<1x4x1xf32>
    %cst_12 = arith.constant 9.99999997E-7 : f32
    %24 = vector.broadcast %cst_12 : f32 to vector<1x4x1xf32>
    %25 = arith.addf %12, %24 : vector<1x4x1xf32>
    %26 = math.sqrt %25 : vector<1x4x1xf32>
    %cst_13 = arith.constant 9.99999997E-7 : f32
    %27 = vector.broadcast %cst_13 : f32 to vector<1x4x1xf32>
    %28 = arith.addf %23, %27 : vector<1x4x1xf32>
    %29 = math.sqrt %28 : vector<1x4x1xf32>
    %30 = arith.subf %5, %16 : vector<1x4x1xf32>
    %31 = arith.mulf %30, %30 : vector<1x4x1xf32>
    %32 = arith.mulf %26, %26 : vector<1x4x1xf32>
    %33 = arith.addf %31, %32 : vector<1x4x1xf32>
    %34 = arith.mulf %29, %29 : vector<1x4x1xf32>
    %35 = arith.addf %33, %34 : vector<1x4x1xf32>
    %cst_14 = arith.constant 2.000000e+00 : f32
    %36 = vector.broadcast %cst_14 : f32 to vector<1x4x1xf32>
    %37 = arith.mulf %36, %26 : vector<1x4x1xf32>
    %38 = arith.mulf %37, %29 : vector<1x4x1xf32>
    %39 = arith.subf %35, %38 : vector<1x4x1xf32>
    %cst_15 = arith.constant 1.000000e+00 : f32
    %40 = vector.broadcast %cst_15 : f32 to vector<1x4x1xf32>
    %41 = arith.addf %40, %39 : vector<1x4x1xf32>
    %cst_16 = arith.constant 1.000000e+00 : f32
    %42 = vector.broadcast %cst_16 : f32 to vector<1x4x1xf32>
    %43 = arith.divf %42, %41 : vector<1x4x1xf32>
    %cst_17 = arith.constant dense<0xFF800000> : vector<1x1xf32>
    %44 = vector.multi_reduction <maximumf>, %43, %cst_17 [1] : vector<1x4x1xf32> to vector<1x1xf32>
    %45 = vector.shape_cast %44 : vector<1x1xf32> to vector<1x1x1xf32>
    %46 = vector.broadcast %45 : vector<1x1x1xf32> to vector<1x4x1xf32>
    %47 = arith.subf %43, %46 : vector<1x4x1xf32>
    %48 = math.exp %47 : vector<1x4x1xf32>
    %cst_18 = arith.constant dense<0.000000e+00> : vector<1x1xf32>
    %49 = vector.multi_reduction <add>, %48, %cst_18 [1] : vector<1x4x1xf32> to vector<1x1xf32>
    %50 = vector.shape_cast %49 : vector<1x1xf32> to vector<1x1x1xf32>
    %51 = vector.broadcast %50 : vector<1x1x1xf32> to vector<1x4x1xf32>
    %52 = arith.divf %48, %51 : vector<1x4x1xf32>
    %53 = arith.mulf %52, %5 : vector<1x4x1xf32>
    %cst_19 = arith.constant 1.000000e+00 : f32
    %54 = vector.broadcast %cst_19 : f32 to vector<1x4x1xf32>
    %55 = arith.subf %54, %52 : vector<1x4x1xf32>
    %56 = arith.mulf %55, %16 : vector<1x4x1xf32>
    %57 = arith.addf %53, %56 : vector<1x4x1xf32>
    %58 = arith.mulf %52, %12 : vector<1x4x1xf32>
    %cst_20 = arith.constant 1.000000e+00 : f32
    %59 = vector.broadcast %cst_20 : f32 to vector<1x4x1xf32>
    %60 = arith.subf %59, %52 : vector<1x4x1xf32>
    %61 = arith.mulf %60, %23 : vector<1x4x1xf32>
    %62 = arith.addf %58, %61 : vector<1x4x1xf32>
    %cst_21 = arith.constant 9.99999997E-7 : f32
    %63 = vector.broadcast %cst_21 : f32 to vector<1x4x1xf32>
    %64 = arith.addf %62, %63 : vector<1x4x1xf32>
    %65 = math.sqrt %64 : vector<1x4x1xf32>
    %66 = arith.divf %65, %26 : vector<1x4x1xf32>
    %67 = vector.broadcast %66 : vector<1x4x1xf32> to vector<1x4x256xf32>
    %68 = arith.mulf %7, %67 : vector<1x4x256xf32>
    %69 = vector.broadcast %57 : vector<1x4x1xf32> to vector<1x4x256xf32>
    %70 = arith.addf %68, %69 : vector<1x4x256xf32>
    %c0_22 = arith.constant 0 : index
    %c0_23 = arith.constant 0 : index
    %c0_24 = arith.constant 0 : index
    %71 = vector.load %arg4[%c0_22, %c0_23, %c0_24] : memref<1x4x256xf32, #tpu.memory_space<vmem>>, vector<1x4x256xf32>
    tpu.vector_store %arg4[%c0_22, %c0_23, %c0_24], %70 {strides = array<i32>} : memref<1x4x256xf32, #tpu.memory_space<vmem>>, vector<1x4x256xf32>,
    return
  }
  func.func @transform_0(%arg0: i32, %arg1: memref<2xi32, #tpu.memory_space<smem>>) -> (i32, i32, i32) {
    %c0_i32 = arith.constant 0 : i32
    %c0_i32_0 = arith.constant 0 : i32
    %c0_i32_1 = arith.constant 0 : i32
    return %arg0, %c0_i32, %c0_i32_0 : i32, i32, i32
  }
  func.func @transform_1(%arg0: i32, %arg1: memref<2xi32, #tpu.memory_space<smem>>) -> (i32, i32, i32) {
    %0 = arith.index_cast %arg0 : i32 to index
    %1 = memref.load %arg1[%0] : memref<2xi32, #tpu.memory_space<smem>>
    %c0_i32 = arith.constant 0 : i32
    %c0_i32_0 = arith.constant 0 : i32
    %c0_i32_1 = arith.constant 0 : i32
    return %1, %c0_i32, %c0_i32_0 : i32, i32, i32
  }
  func.func @transform_2(%arg0: i32, %arg1: memref<2xi32, #tpu.memory_space<smem>>) -> (i32, i32, i32) {
    %c0_i32 = arith.constant 0 : i32
    %c0_i32_0 = arith.constant 0 : i32
    %c0_i32_1 = arith.constant 0 : i32
    return %arg0, %c0_i32, %c0_i32_0 : i32, i32, i32
  }
}

</mosaic_0001>

<bundles_post_ra>
// kernel: tpu_custom_call.1
= control target key start
LH: loop header
LB: loop body
LE: loop exit
PB: predicated region body
PF: predicated region fallthrough
CT: control target
= control target key end

     0   :  { %s1086_s0 = inlined_call_operand.hbm [shape: s32[2], index: 0, kind: input, shape index: {}]   ;;  %s1087_s1 = inlined_call_operand.hbm [shape: f32[2,4,256], index: 1, kind: input, shape index: {}]   ;;  %s1088_s2 = inlined_call_operand.hbm [shape: f32[2,4,256], index: 2, kind: input, shape index: {}]   ;;  %s1089_s3 = inlined_call_operand.hbm [shape: f32[2,4,256], index: 3, kind: output, shape index: {}]  }
   0x1   :  { %1096 = sst [smem:[#allocation16_spill]] %s1087_s1  ;;  %s579_s14 = scalar_lea.hbm %s1086_s0, 16 }
   0x2   :  { %p580_p0 = scmp.ne.s32.totalorder %s1086_s0, %s579_s14  ;;  %p583_p1 = scmp.lt.u32.totalorder %s579_s14, %s1086_s0 }
   0x4   :  { %p585_p2 = pnand %p583_p1, %p580_p0 }
   0x6   :  { %588 = shalt.err (!%p585_p2)  }
   0x7   :  { %s747_s19 = smov [#allocation3]  }
   0x8   :  { %9 = dma.hbm_to_smem %s1086_s0, 16, %s747_s19, [#allocation2] }
   0x9   :  { %705 = dma.done.wait [#allocation2], 16 }
   0xa   :  { %706 = vsyncadd [#allocation2], 4294967280 }
   0xb   :  { %11 = sfence }
   0xc   :  { %12 = vsyncpa [#allocation5], 0 }
   0xd   :  { %14 = vsyncpa [#allocation5 + $0x1], 0 }
   0xe   :  { %15 = vsyncpa [#allocation8], 0 }
   0xf   :  { %17 = vsyncpa [#allocation8 + $0x1], 0 }
  0x10   :  { %18 = vsyncpa [#allocation6], 0 }
  0x11   :  { %20 = vsyncpa [#allocation6 + $0x1], 0  ;;  %s784_s22 = smov 0   ;;  %s786_s23 = smov 0  }
  0x12   :  { %s788_s24 = smov 0   ;;  %s790_s25 = smov 0  }
  0x13   :  { %s792_s26 = smov 0   ;;  %s794_s0 = smov 0  }
  0x14   :  { %s796_s27 = smov 0  }
  0x15 LB: > { %s820_s28 = sadd.s32 4294967295, %s745_s27   ;;  %s461_s29 = sadd.s32 4294967294, %s745_s27   ;;  %s745_s27 = sphi %s796_s27, %s1124_s27   ;;  %s741_s0 = sphi %s794_s0, %s1123_s0   ;;  %s737_s26 = sphi %s792_s26, %s1122_s26   ;;  %s733_s25 = sphi %s790_s25, %s1121_s25   ;;  %s729_s24 = sphi %s788_s24, %s1120_s24   ;;  %s725_s23 = sphi %s786_s23, %s1119_s23   ;;  %s721_s22 = sphi %s784_s22, %s1118_s22  }
  0x16   : > { %s824_s30 = sadd.s32 1, %s745_s27   ;;  %s33_s4 = sadd.s32 1, %s741_s0 }
  0x17   : > { %s30_s5 = ssub.s32 %s745_s27, %s824_s30  ;;  %p40_p3 = scmp.ne.s32.totalorder %s741_s0, %s737_s26 }
  0x18   : > { %p31_p4 = scmp.eq.s32.totalorder %s30_s5, 0  ;;  %p1091_p5 = scmp.eq.s32.totalorder %s745_s27, 0 }
  0x19   : > { %p46_p6 = scmp.ne.s32.totalorder %s737_s26, %s733_s25  ;;  %p1092_p7 = scmp.eq.s32.totalorder %s820_s28, 0 }
  0x1a   : > { %s836_s6 = scalar_select %p31_p4, %s741_s0, %s33_s4  }
  0x1b   : > { %p840_p8 = por %p1091_p5, %p40_p3  ;;  %p846_p9 = por %p1092_p7, %p46_p6 }
  0x1c   : > { %s851_s9 = sld [smem:[#allocation3 + %s824_s30]]  ;;  %p98_p10 = scmp.eq.s32.totalorder %s820_s28, 1 }
  0x1d   : > { %s1098_s8 = scalar_select %p846_p9, 1, 0 }
  0x1e   : > { %p104_p11 = scmp.eq.s32.totalorder %s461_s29, 1  ;;  %p855_p13 = por %p98_p10, %p40_p3 }
  0x1f   : > { %p1090_p0 = scmp.lt.s32.totalorder %s745_s27, 2  ;;  %s124_s12 = sand.u32 1, %s741_s0  }
  0x20   : > { %s1099_s10 = scalar_select %p855_p13, 1, 0 }
  0x21   : > { %p860_p1 = por %p104_p11, %p46_p6  ;;  %s464_s13 = sshll.u32 %s124_s12, 3 }
  0x22   : > { %s479_s14 = sshll.u32 %s745_s27, 7  ;;  %s1101_s1 = sld [smem:[#allocation16_spill]] }
  0x23   : > { %s1100_s11 = scalar_select %p860_p1, 1, 0 }
  0x24   : > { %s128_s18 = scalar_lea.vmem [#allocation4], %s464_s13  ;;  %p877_p2 = pnand %p1090_p0, %p840_p8 }
  0x25   : > { %s136_s19 = sshll.u32 %s128_s18, 4  ;;  %s125_s21 = scalar_lea.sflag [#allocation5], %s124_s12  ;;  %s871_s19 = int_to_ptr.vmem [resolvable:$true] %s136_s19 }
  0x26   : > { %p591_p10 = pneg %p877_p2 }
  0x28   : > { %s869_s17 = scalar_lea.hbm %s1101_s1, %s479_s14  ;;  %s594_s7 = scalar_lea.hbm %s1101_s1, 256 }
  0x29   : > { %s589_s29 = scalar_lea.hbm %s869_s17, 128  ;;  %p595_p8 = scmp.lt.u32.totalorder %s869_s17, %s1101_s1 }
  0x2a   : > { %p590_p6 = scmp.ne.s32.totalorder %s869_s17, %s589_s29  ;;  %p596_p0 = scmp.lt.u32.totalorder %s594_s7, %s589_s29 }
  0x2b   : > { %p598_p7 = scmp.lt.u32.totalorder %s589_s29, %s869_s17 }
  0x2c   : > { %p592_p11 = pnand %p591_p10, %p590_p6  ;;  %p597_p5 = por %p596_p0, %p595_p8 }
  0x2e   : > { %p593_p12 = pneg %p592_p11  ;;  %p599_p3 = por %p598_p7, %p597_p5 }
  0x30   : > { %p600_p4 = pnand %p599_p3, %p593_p12 }
  0x32   : > { %603 = shalt.err (!%p600_p4)
}
  0x33   : > { %s604_s12 = scalar_lea.vmem %s871_s19, 128  ;;  %s748_s15 = smov [#allocation4]  }
  0x34   : > { %p605_p6 = scmp.ne.s32.totalorder %s871_s19, %s604_s12  ;;  %s609_s16 = sshll.u32 %s748_s15, 4  ;;  %s610_s16 = int_to_ptr.vmem [resolvable:$false] %s609_s16 }
  0x35   : > { %s611_s18 = scalar_lea.vmem %s610_s16, 256  ;;  %p612_p13 = scmp.lt.s32.totalorder %s871_s19, %s610_s16 }
  0x36   : > { %p607_p11 = pnand %p605_p6, %p591_p10  ;;  %p613_p0 = scmp.lt.s32.totalorder %s611_s18, %s604_s12 }
  0x38   : > { %p608_p1 = pneg %p607_p11  ;;  %p614_p8 = por %p613_p0, %p612_p13 }
  0x3a   : > { %p615_p5 = pnand %p614_p8, %p608_p1 }
  0x3c   : > { %618 = shalt.err (!%p615_p5)
}
  0x3d   : > { %493 = dma.hbm_to_vmem [thread:$0]  (!%p877_p2), %s869_s17, 128, %s871_s19, %s125_s21  }
  0x3e   : > { %p1103_p7 = scmp.lt.s32.totalorder %s745_s27, 3  ;;  %p1104_p12 = scmp.ge.s32.totalorder %s745_s27, 1 }
  0x3f   : > { %s56_s29 = sld [smem:[#allocation3 + %s745_s27]]  ;;  %p68_p1 = scmp.ne.s32.totalorder %s729_s24, %s725_s23 }
  0x40   : > { %p912_p13 = pnand %p1104_p12, %p1103_p7  ;;  %p74_p3 = scmp.ne.s32.totalorder %s725_s23, %s721_s22 }
  0x41   : > { %p1106_p4 = scmp.eq.s32.totalorder %s820_s28, 0  ;;  %s143_s5 = sand.u32 1, %s729_s24  }
  0x42   : > { %p1108_p6 = scmp.eq.s32.totalorder %s745_s27, 0  ;;  %s61_s17 = sadd.s32 1, %s729_s24 }
  0x43   : > { %p923_p10 = por %p74_p3, %p1106_p4  ;;  %s467_s21 = sshll.u32 %s143_s5, 3 }
  0x44   : > { %p70_p11 = por %p68_p1, %p1108_p6  ;;  %p1109_p0 = scmp.lt.s32.totalorder %s745_s27, 2 }
  0x45   : > { %s1107_s4 = scalar_select %p923_p10, 1, 0 }
  0x46   : > { %s58_s19 = ssub.s32 %s56_s29, %s851_s9  ;;  %p934_p8 = pnand %p1109_p0, %p70_p11 }
  0x47   : > { %p59_p2 = scmp.eq.s32.totalorder %s58_s19, 0  ;;  %p1111_p5 = pmov %p1109_p0 }
  0x48   : > { %s483_s22 = scalar_select %p70_p11, [#allocation3], [#allocation10] }
  0x49   : > { %s939_s13 = scalar_select %p59_p2, %s729_s24, %s61_s17  }
  0x4a   : > { %s484_s14 = scalar_select %p70_p11, %s745_s27, 0 }
  0x4b   : > { %s1126_s22 = smov (!%p1111_p5, %s483_s22), [#allocation11]  ;;  %p1112_p7 = pmov %p1109_p0 }
  0x4c   : > { %s147_s15 = scalar_lea.vmem [#allocation7], %s467_s21  ;;  %s144_s17 = scalar_lea.sflag [#allocation8], %s143_s5 }
  0x4d   : > { %s1128_s14 = smov (!%p1112_p7, %s484_s14), 0  ;;  %s156_s9 = sshll.u32 %s147_s15, 4  ;;  %s946_s9 = int_to_ptr.vmem [resolvable:$true] %s156_s9 }
  0x4e   : > { %s148_s12 = sld [smem:[%s1126_s22 + %s1128_s14]]  ;;  %p621_p1 = pneg %p934_p8 }
  0x4f   : > { %s624_s14 = scalar_lea.hbm %s1088_s2, 256 }
  0x54   : > { %s480_s16 = sshll.u32 %s148_s12, 7 }
  0x55   : > { %s951_s19 = scalar_lea.hbm %s1088_s2, %s480_s16 }
  0x56   : > { %s619_s1 = scalar_lea.hbm %s951_s19, 128  ;;  %p625_p6 = scmp.lt.u32.totalorder %s951_s19, %s1088_s2 }
  0x57   : > { %p620_p12 = scmp.ne.s32.totalorder %s951_s19, %s619_s1  ;;  %p626_p11 = scmp.lt.u32.totalorder %s624_s14, %s619_s1 }
  0x58   : > { %p628_p0 = scmp.lt.u32.totalorder %s619_s1, %s951_s19 }
  0x59   : > { %p622_p3 = pnand %p621_p1, %p620_p12  ;;  %p627_p2 = por %p626_p11, %p625_p6 }
  0x5b   : > { %p623_p4 = pneg %p622_p3  ;;  %p629_p5 = por %p628_p0, %p627_p2 }
  0x5d   : > { %p630_p7 = pnand %p629_p5, %p623_p4 }
  0x5f   : > { %633 = shalt.err (!%p630_p7)
}
  0x60   : > { %s634_s5 = scalar_lea.vmem %s946_s9, 128  ;;  %s749_s16 = smov [#allocation7]  }
  0x61   : > { %p635_p12 = scmp.ne.s32.totalorder %s946_s9, %s634_s5  ;;  %s639_s18 = sshll.u32 %s749_s16, 4  ;;  %s640_s18 = int_to_ptr.vmem [resolvable:$false] %s639_s18 }
  0x62   : > { %s641_s29 = scalar_lea.vmem %s640_s18, 256  ;;  %p642_p9 = scmp.lt.s32.totalorder %s946_s9, %s640_s18 }
  0x63   : > { %p637_p3 = pnand %p635_p12, %p621_p1  ;;  %p643_p6 = scmp.lt.s32.totalorder %s641_s29, %s634_s5 }
  0x65   : > { %p638_p10 = pneg %p637_p3  ;;  %p644_p11 = por %p643_p6, %p642_p9 }
  0x67   : > { %p645_p2 = pnand %p644_p11, %p638_p10 }
  0x69   : > { %648 = shalt.err (!%p645_p2)
}
  0x6a   : > { %498 = dma.hbm_to_vmem [thread:$0]  (!%p934_p8), %s951_s19, 128, %s946_s9, %s144_s17  }
  0x6b   : > { %165 = sbr.rel (%p912_p13) target bundleno = 563 (0x233), region = 28  ;;  %s981_s1 = sand.u32 (!%p912_p13), 1, %s737_s26  }
  0x6c   : > { %s471_s21 = sshll.u32 (!%p912_p13), %s981_s1, 3  ;;  %s168_s22 = scalar_lea.sflag (!%p912_p13), [#allocation5], %s981_s1 }
  0x6d   : > { %s171_s14 = scalar_lea.vmem (!%p912_p13), [#allocation4], %s471_s21  ;;  %p1113_p9 = scmp.ne.s32.totalorder (!%p912_p13), %s1098_s8, 0 }
  0x72   : > { %708 = dma.done.wait (%p1113_p9), %s168_s22, 128  }
  0x73   : > { %710 = vsyncadd (%p1113_p9), %s168_s22, 4294967168  ;;  %s176_s20 = sand.u32 1, %s725_s23   ;;  %p1114_p13 = scmp.ne.s32.totalorder %s1107_s4, 0 }
  0x74   : > { %s472_s7 = sshll.u32 %s176_s20, 3  ;;  %s177_s9 = scalar_lea.sflag [#allocation8], %s176_s20 }
  0x75   : > { %s180_s19 = scalar_lea.vmem [#allocation7], %s472_s7 }
  0x76   : > { %712 = dma.done.wait (%p1114_p13), %s177_s9, 128  }
  0x77   : > { %714 = vsyncadd (%p1114_p13), %s177_s9, 4294967168  ;;  %vm212_vm0 = vcmask 1043456   ;;  %v207_v0 = vld [vmem:[%s171_s14] sm:$0xff]  ;;  %v208_v1 = vld [vmem:[%s180_s19] sm:$0xff]  ;;  %v750_v10 = vmov 839922192   ;;  %v223_v12 = vlaneseq }
  0x78   : > { %v210_v2 = vcombine.high %v207_v0, %v207_v0  ;;  %v213_v3 = vsel %vm212_vm0, %v207_v0, 0.0  ;;  %v240_v4 = vcombine.high %v208_v1, %v208_v1  ;;  %v242_v6 = vsel %vm212_vm0, %v208_v1, 0.0  ;;  %s481_s8 = sshll.u32 %s820_s28, 7  ;;  %s205_s4 = scalar_lea.vmem [#allocation9], %s471_s21 }
  0x79   : > { %v221_v11 = vunpack.c.l.s4 %v750_v10  ;;  %v224_v14 = vshrl.u32 %v223_v12, 7  ;;  %s368_s17 = sshll.u32 %s205_s4, 4  ;;  %s1033_s5 = scalar_lea.hbm %s1089_s3, %s481_s8  ;;  %s1035_s17 = int_to_ptr.vmem [resolvable:$true] %s368_s17 }
  0x7a   : > { %v214_v5 = vsel %vm212_vm0, %v210_v2, 0.0  ;;  %v243_v7 = vsel %vm212_vm0, %v240_v4, 0.0  ;;  %s354_s28 = scalar_lea.sflag [#allocation6], %s981_s1  ;;  %s649_s16 = scalar_lea.vmem %s1035_s17, 128 }
  0x7b   : > { %v215_v8 = vadd.f32 %v214_v5, %v213_v3  ;;  %v244_v9 = vadd.f32 %v243_v7, %v242_v6  ;;  %v222_v13 = vunpack.c.0.s8 %v221_v11  ;;  %p650_p10 = scmp.ne.s32.totalorder %s1035_s17, %s649_s16  ;;  %p1115_p8 = scmp.ne.s32.totalorder %s1099_s10, 0 }
  0x7c   : > { %s751_s18 = smov [#allocation9]  }
  0x7d   : > { %216 = vadd.xlane.f32.xlu0 %v215_v8  ;;  %v1000_v15 = vsub.s32 %v222_v13, %v224_v14  ;;  %p651_p1 = pnand %p650_p10, %p1115_p8  ;;  %s653_s29 = sshll.u32 %s751_s18, 4  ;;  %s654_s29 = int_to_ptr.vmem [resolvable:$false] %s653_s29 }
  0x7e   : > { %s655_s21 = scalar_lea.vmem %s654_s29, 256  ;;  %p656_p0 = scmp.lt.s32.totalorder %s1035_s17, %s654_s29 }
  0x7f   : > { %p652_p4 = pneg %p651_p1  ;;  %p657_p5 = scmp.lt.s32.totalorder %s655_s21, %s649_s16 }
  0x81   : > { %245 = vadd.xlane.f32.xlu0 %v244_v9  ;;  %p658_p7 = por %p657_p5, %p656_p0 }
  0x83   : > { %p659_p12 = pnand %p658_p7, %p652_p4 }
 0x10a   : > { %v217_v16 = vpop.xlane.xlu0 %216 }
 0x10b   : > { %v1002_v17 = vmul.f32 0.00390625, %v217_v16 }
 0x10d   : > { %v226_v18 = vrot.slane %v1002_v17, %v1000_v15 }
 0x10e   : > { %v246_v19 = vpop.xlane.xlu0 %245 }
 0x10f   : > { %v1006_v20 = vmul.f32 0.00390625, %v246_v19  ;;  %v1008_v21 = vsub.f32 %v207_v0, %v226_v18 }
 0x111   : > { %v255_v22 = vrot.slane %v1006_v20, %v1000_v15  ;;  %v229_v23 = vmul.f32 %v1008_v21, %v1008_v21  ;;  %v284_v44 = vsub.f32 %v1002_v17, %v1006_v20 }
 0x113   : > { %v231_v24 = vcombine.high %v229_v23, %v229_v23  ;;  %v257_v25 = vsub.f32 %v208_v1, %v255_v22  ;;  %v233_v26 = vsel %vm212_vm0, %v229_v23, 0.0  ;;  %v285_v50 = vmul.f32 %v284_v44, %v284_v44 }
 0x115   : > { %v234_v27 = vsel %vm212_vm0, %v231_v24, 0.0  ;;  %v258_v28 = vmul.f32 %v257_v25, %v257_v25 }
 0x116   : > { %v235_v29 = vadd.f32 %v234_v27, %v233_v26 }
 0x117   : > { %v260_v30 = vcombine.high %v258_v28, %v258_v28  ;;  %v262_v31 = vsel %vm212_vm0, %v258_v28, 0.0 }
 0x118   : > { %236 = vadd.xlane.f32.xlu1 %v235_v29 }
 0x119   : > { %v263_v32 = vsel %vm212_vm0, %v260_v30, 0.0 }
 0x11a   : > { %v264_v33 = vadd.f32 %v263_v32, %v262_v31 }
 0x11c   : > { %265 = vadd.xlane.f32.xlu1 %v264_v33 }
 0x1a5   : > { %v237_v34 = vpop.xlane.xlu1 %236 }
 0x1a6   : > { %v238_v35 = vmul.f32 0.003921569, %v237_v34 }
 0x1a8   : > { %v268_v36 = vadd.f32 1e-06, %v238_v35 }
 0x1a9   : > { %v266_v37 = vpop.xlane.xlu1 %265 }
 0x1aa   : > { %565 = vrsqrt.f32 %v268_v36  ;;  %v267_v38 = vmul.f32 0.003921569, %v266_v37  ;;  %vm271_vm1 = vcmp.eq.f32.partialorder %v268_v36, inf  ;;  %v274_v42 = vand.u32 2147483648, %v268_v36 }
 0x1ab   : > { %vm273_vm2 = vcmp.eq.f32.partialorder %v268_v36, 0.0 }
 0x1ac   : > { %v276_v39 = vadd.f32 1e-06, %v267_v38 }
 0x1ae   : > { %567 = vrsqrt.f32 %v276_v39  ;;  %vm279_vm3 = vcmp.eq.f32.partialorder %v276_v39, inf  ;;  %v282_v49 = vand.u32 2147483648, %v276_v39  ;;  %vm281_vm4 = vcmp.eq.f32.partialorder %v276_v39, 0.0 }
 0x1b4   : > { %v566_v40 = vpop.eup %565 }
 0x1b5   : > { %v270_v41 = vmul.f32 %v566_v40, %v268_v36 }
 0x1b7   : > { %v272_v43 = vsel %vm271_vm1, %v268_v36, %v270_v41 }
 0x1b8   : > { %v275_v45 = vsel %vm273_vm2, %v274_v42, %v272_v43  ;;  %v568_v46 = vpop.eup %567 }
 0x1b9   : > { %v286_v47 = vmul.f32 %v275_v45, %v275_v45  ;;  %v278_v48 = vmul.f32 %v568_v46, %v276_v39  ;;  %v290_v54 = vmul.f32 2.0, %v275_v45 }
 0x1bb   : > { %v280_v51 = vsel %vm279_vm3, %v276_v39, %v278_v48  ;;  %v287_v53 = vadd.f32 %v286_v47, %v285_v50 }
 0x1bc   : > { %v283_v52 = vsel %vm281_vm4, %v282_v49, %v280_v51 }
 0x1bd   : > { %v288_v55 = vmul.f32 %v283_v52, %v283_v52  ;;  %v291_v57 = vmul.f32 %v290_v54, %v283_v52 }
 0x1bf   : > { %v289_v56 = vadd.f32 %v288_v55, %v287_v53 }
 0x1c1   : > { %v292_v58 = vsub.f32 %v289_v56, %v291_v57 }
 0x1c3   : > { %v293_v59 = vadd.f32 1.0, %v292_v58 }
 0x1c5   : > { %569 = vrcp.f32 %v293_v59 }
 0x1cf   : > { %v570_v60 = vpop.eup %569 }
 0x1d0   : > { %v296_v61 = vsel %vm212_vm0, %v570_v60, -inf }
 0x1d1   : > { %v297_v62 = vrot.slane %v296_v61, 4 }
 0x1d3   : > { %v298_v63 = vmax.f32 %v296_v61, %v297_v62 }
 0x1d5   : > { %v299_v0 = vrot.slane %v298_v63, 2 }
 0x1d7   : > { %v300_v1 = vmax.f32 %v298_v63, %v299_v0 }
 0x1d9   : > { %v301_v2 = vrot.slane %v300_v1, 1 }
 0x1db   : > { %v302_v3 = vmax.f32 %v300_v1, %v301_v2 }
 0x1dd   : > { %v303_v4 = vsub.f32 %v570_v60, %v302_v3 }
 0x1df   : > { %v304_v5 = vmul.f32 1.442695, %v303_v4 }
 0x1e1   : > { %571 = vpow2.f32 %v304_v5 }
 0x1eb   : > { %v572_v6 = vpop.eup %571 }
 0x1ec   : > { %v306_v7 = vsel %vm212_vm0, %v572_v6, 0.0 }
 0x1ed   : > { %v307_v8 = vrot.slane %v306_v7, 4 }
 0x1ef   : > { %v308_v9 = vadd.f32 %v307_v8, %v306_v7 }
 0x1f1   : > { %v309_v10 = vrot.slane %v308_v9, 2 }
 0x1f3   : > { %v310_v11 = vadd.f32 %v309_v10, %v308_v9 }
 0x1f5   : > { %v311_v12 = vrot.slane %v310_v11, 1 }
 0x1f7   : > { %v312_v13 = vadd.f32 %v311_v12, %v310_v11 }
 0x1f9   : > { %573 = vrcp.f32 %v312_v13 }
 0x203   : > { %v574_v14 = vpop.eup %573 }
 0x204   : > { %v314_v16 = vmul.f32 %v574_v14, %v572_v6 }
 0x206   : > { %v316_v18 = vsub.f32 1.0, %v314_v16  ;;  %v319_v19 = vmul.f32 %v314_v16, %v238_v35  ;;  %v315_v29 = vmul.f32 %v314_v16, %v1002_v17 }
 0x208   : > { %v320_v22 = vmul.f32 %v316_v18, %v267_v38  ;;  %v317_v26 = vmul.f32 %v316_v18, %v1006_v20 }
 0x20a   : > { %v321_v23 = vadd.f32 %v320_v22, %v319_v19  ;;  %v318_v33 = vadd.f32 %v317_v26, %v315_v29 }
 0x20c   : > { %v322_v24 = vadd.f32 1e-06, %v321_v23  ;;  %v349_v20 = vrot.slane %v318_v33, %v1000_v15 }
 0x20e   : > { %575 = vrsqrt.f32 %v322_v24  ;;  %vm325_vm5 = vcmp.eq.f32.partialorder %v322_v24, inf  ;;  %v328_v28 = vand.u32 2147483648, %v322_v24  ;;  %vm327_vm6 = vcmp.eq.f32.partialorder %v322_v24, 0.0 }
 0x20f   : > { %577 = vrcp.f32 %v275_v45 }
 0x218   : > { %v576_v25 = vpop.eup %575 }
 0x219   : > { %v324_v27 = vmul.f32 %v576_v25, %v322_v24  ;;  %v578_v31 = vpop.eup %577 }
 0x21b   : > { %v326_v30 = vsel %vm325_vm5, %v322_v24, %v324_v27 }
 0x21c   : > { %v329_v32 = vsel %vm327_vm6, %v328_v28, %v326_v30 }
 0x21d   : > { %v331_v34 = vmul.f32 %v578_v31, %v329_v32 }
 0x21f   : > { %v339_v35 = vrot.slane %v331_v34, %v1000_v15 }
 0x221   : > { %v341_v36 = vmul.f32 %v339_v35, %v1008_v21 }
 0x223   : > { %v351_v37 = vadd.f32 %v349_v20, %v341_v36 }
 0x225   : > { %352 = vst [vmem:[%s205_s4] sm:$0xff] %v351_v37 }
 0x226   : > { %662 = shalt.err (!%p659_p12)
}
 0x227   : > { %s663_s1 = scalar_lea.hbm %s1033_s5, 128  ;;  %s667_s20 = scalar_lea.hbm %s1089_s3, 256 }
 0x228   : > { %p664_p3 = scmp.ne.s32.totalorder %s1033_s5, %s663_s1  ;;  %p668_p2 = scmp.lt.u32.totalorder %s1033_s5, %s1089_s3 }
 0x229   : > { %p669_p9 = scmp.lt.u32.totalorder %s667_s20, %s663_s1  ;;  %p671_p10 = scmp.lt.u32.totalorder %s663_s1, %s1033_s5 }
 0x22a   : > { %p665_p6 = pnand %p664_p3, %p1115_p8 }
 0x22b   : > { %p670_p13 = por %p669_p9, %p668_p2 }
 0x22c   : > { %p666_p11 = pneg %p665_p6 }
 0x22d   : > { %p672_p1 = por %p671_p10, %p670_p13 }
 0x22f   : > { %p673_p4 = pnand %p672_p1, %p666_p11 }
 0x231   : > { %676 = shalt.err (!%p673_p4)
}
 0x232   : > { %488 = dma.vmem_to_hbm [thread:$0]  (%p1115_p8), %s1035_s17, 128, %s1033_s5, %s354_s28  }
 0x233 PF: > { %s380_s19 = sand.u32 1, %s733_s25   ;;  %p1116_p0 = scmp.ne.s32.totalorder %s1100_s11, 0 }
 0x234   : > { %p1117_p5 = scmp.ge.s32.totalorder %s745_s27, 2  ;;  %s381_s8 = scalar_lea.sflag [#allocation6], %s380_s19 }
 0x236   : > { %p500_p7 = pnand %p1117_p5, %p1116_p0 }
 0x238   : > { %716 = dma.done.wait (!%p500_p7), %s381_s8, 128  }
 0x239   : > { %718 = vsyncadd (!%p500_p7), %s381_s8, 4294967168  ;;  %p23_p8 = scmp.ge.s32.totalorder %s824_s30, 4   ;;  %s1118_s22 = smov %s725_s23 }
 0x23a   : > { %s1119_s23 = smov %s729_s24  ;;  %s1120_s24 = smov %s939_s13 }
 0x23b   : > { %s1121_s25 = smov %s737_s26  ;;  %s1122_s26 = smov %s741_s0 }
 0x23c   : > { %s1123_s0 = smov %s836_s6  ;;  %s1124_s27 = smov %s824_s30 }
 0x23d   :  { %25 = sbr.rel (!%p23_p8) target bundleno = 21 (0x15), region = 86 }
 0x244   :  { %386 = vsyncpa [#allocation5], 1 }
 0x245   :  { %388 = vsyncpa [#allocation5 + $0x1], 1 }
 0x246   :  { %389 = vsyncpa [#allocation8], 1 }
 0x247   :  { %391 = vsyncpa [#allocation8 + $0x1], 1 }
 0x248   :  { %392 = vsyncpa [#allocation6], 1 }
 0x249   :  { %394 = vsyncpa [#allocation6 + $0x1], 1 }

</bundles_post_ra>
